<compile_context>
chip_gen: v7x
topology: tpu7x:2x2x1
jax: 0.10.0
libtpu: 0.0.40
codegen_flags: <defaults>
</compile_context>

<pallas_src>
import jax
import jax.numpy as jnp
from jax import lax
from jax.experimental import pallas as pl
from jax.experimental.pallas import tpu as pltpu


def mlp_kernel(x_ref, w1_ref, b1_ref, w2_ref, b2_ref, w3_ref, b3_ref, o_ref):
    # x arrives f32 (no wrapper-side cast => half the HBM traffic on the
    # dominant operand); cast to the MXU operand dtype on the VPU here,
    # hidden under the DMA of the next tile.
    x = x_ref[...].astype(w1_ref.dtype)                              # (tb, D)

    # fc1 + ReLU : MXU matmul (bf16 operands, f32 accumulate); bias/ReLU f32.
    h1 = jnp.dot(x, w1_ref[...], preferred_element_type=jnp.float32) + b1_ref[...]
    h1 = jnp.maximum(h1, 0.0)
    # dropout1 -> identity (eval mode)

    # fc2 + ReLU
    h2 = jnp.dot(h1.astype(w2_ref.dtype), w2_ref[...],
                 preferred_element_type=jnp.float32) + b2_ref[...]
    h2 = jnp.maximum(h2, 0.0)
    # dropout2 -> identity (eval mode)

    # fc3, lane-dense: contract the H2 axis of w3 (1, H2) against the last
    # axis of h2 (tb, H2) -> (1, tb) row, so the batch dim lands on lanes and
    # the store is unmasked.  b3 is an SMEM scalar.
    o_row = lax.dot_general(
        w3_ref[...], h2,
        dimension_numbers=(((1,), (1,)), ((), ())),
        preferred_element_type=jnp.float32) + b3_ref[0]
    o_ref[0] = o_row.astype(o_ref.dtype)                             # (1, tb)


# ----------------------------- tiling helpers -------------------------------

def _round_to_8(n):
    return max(8, (n // 8) * 8)


def _vmem_capacity_bytes():
    # Per-TensorCore VMEM: 128 MiB on v5e/v6e, 64 MiB on v7x.  Fall back to the
    # smallest (v7x) if the query is unavailable.
    try:
        return int(pltpu.get_tpu_info().vmem_capacity_bytes)
    except Exception:
        return 64 * 1024 * 1024


def _vmem_budget_and_limit():
    cap = _vmem_capacity_bytes()
    # Scoped-VMEM limit handed to Mosaic (~48 MiB on v7x, ~96 MiB on v5e/v6e),
    # plus a smaller tile budget leaving headroom for compiler-internal scratch.
    vmem_limit = min(max((3 * cap) // 4, 32 * 1024 * 1024), 128 * 1024 * 1024)
    tile_budget = (3 * vmem_limit) // 4
    return tile_budget, vmem_limit


def _vmem_usage_bytes(tb, D, H1=64, H2=8):
    x_io = 2 * tb * D * 4        # double-buffered f32 x tiles
    x_cast = tb * D * 2          # in-kernel bf16 copy of the x tile
    w1 = 2 * D * H1 * 2          # bf16 W1 (default double buffer, const index)
    w2 = 2 * H1 * H2 * 2
    h1 = tb * H1 * 4             # f32 intermediates
    h2 = tb * H2 * 4
    out = 2 * tb * 4             # double-buffered lane-dense f32 out row
    misc = 512 * 1024            # biases, w3 row, compiler-internal scratch
    return x_io + x_cast + w1 + w2 + h1 + h2 + out + misc


def _choose_batch_tile(B, D, tile_budget_bytes, batch_tile=None):
    b_pad = ((B + 7) // 8) * 8
    if batch_tile is None:
        # ~4 MiB of f32 x per grid step amortizes the ~0.35us/step overhead.
        tb = (4 * 1024 * 1024) // (D * 4)
        tb = min(max(tb, 512), 4096)
    else:
        tb = batch_tile
    tb = _round_to_8(min(tb, b_pad))
    while tb > 8 and _vmem_usage_bytes(tb, D) > tile_budget_bytes:
        tb = _round_to_8(tb // 2)
    return tb


# ------------------------------- wrapper -------------------------------------

def mlp_classifier_forward(x, params, *, batch_tile=None,
                           compute_dtype=jnp.bfloat16):
    """x: (B, input_dim) float32.  Returns (B, 1) float32.

    compute_dtype is the MXU operand precision for fc1/fc2 (x is rounded to it
    inside the kernel; W1/W2 are pre-cast once).  Pass jnp.float32 for a
    bit-faithful (slower) f32 path — this is the caller-visible precision knob.
    """
    w1, b1, w2, b2, w3, b3 = params
    B, D = x.shape
    H1 = w1.shape[1]   # 64
    H2 = w2.shape[1]   # 8
    O = w3.shape[1]    # 1

    tile_budget, vmem_limit = _vmem_budget_and_limit()
    tb = _choose_batch_tile(B, D, tile_budget, batch_tile)
    num_tiles = pl.cdiv(B, tb)

    # Weights are tiny and VMEM-resident: pre-cast once.  x is NOT pre-cast.
    w1_c = w1.astype(compute_dtype)
    w2_c = w2.astype(compute_dtype)
    b1_r = b1.reshape(1, H1).astype(jnp.float32)
    b2_r = b2.reshape(1, H2).astype(jnp.float32)
    w3_r = w3.reshape(1, H2).astype(jnp.float32)   # (H2, 1) -> row (1, H2)
    b3_r = b3.reshape(1).astype(jnp.float32)       # SMEM scalar

    flops = 2 * B * (D * H1 + H1 * H2 + H2 * O)
    bytes_accessed = (x.size * x.dtype.itemsize
                      + w1_c.size * w1_c.dtype.itemsize
                      + w2_c.size * w2_c.dtype.itemsize
                      + (b1_r.size + b2_r.size + w3_r.size + b3_r.size) * 4
                      + num_tiles * tb * 4)

    out_padded = pl.pallas_call(
        mlp_kernel,
        out_shape=jax.ShapeDtypeStruct((num_tiles, 1, tb), jnp.float32),
        grid_spec=pltpu.PrefetchScalarGridSpec(
            num_scalar_prefetch=0,
            grid=(num_tiles,),
            in_specs=[
                pl.BlockSpec((tb, D), lambda i: (i, 0)),    # x tile (f32)
                pl.BlockSpec((D, H1), lambda i: (0, 0)),    # W1 (resident)
                pl.BlockSpec((1, H1), lambda i: (0, 0)),    # b1
                pl.BlockSpec((H1, H2), lambda i: (0, 0)),   # W2 (resident)
                pl.BlockSpec((1, H2), lambda i: (0, 0)),    # b2
                pl.BlockSpec((1, H2), lambda i: (0, 0)),    # W3 row
                pl.BlockSpec(memory_space=pltpu.MemorySpace.SMEM),  # b3 scalar
            ],
            out_specs=pl.BlockSpec((1, 1, tb), lambda i: (i, 0, 0)),
        ),
        compiler_params=pltpu.CompilerParams(
            dimension_semantics=("parallel",),
            vmem_limit_bytes=int(vmem_limit)),
        cost_estimate=pl.CostEstimate(
            flops=flops, transcendentals=0, bytes_accessed=bytes_accessed),
    )(x, w1_c, b1_r, w2_c, b2_r, w3_r, b3_r)

    # Padded rows (when B % tb != 0) hold garbage but rows are independent;
    # they are dropped here.
    return out_padded.reshape(num_tiles * tb)[:B].reshape(B, O)


# ------------------------------ init / refs ----------------------------------

def init_params(key, input_dim):
    """Deterministic init mimicking nn.Linear default (uniform ±1/sqrt(fan_in)).
    Weights stored as (in_features, out_features)."""
    dims = [(input_dim, 64), (64, 8), (8, 1)]
    params = []
    for (fan_in, fan_out) in dims:
        key, kw, kb = jax.random.split(key, 3)
        bound = 1.0 / jnp.sqrt(fan_in)
        w = jax.random.uniform(kw, (fan_in, fan_out), jnp.float32, -bound, bound)
        b = jax.random.uniform(kb, (fan_out,), jnp.float32, -bound, bound)
        params += [w, b]
    return tuple(params)


def mlp_reference_f32(x, params):
    """Pure f32 reference (PyTorch eval-mode semantics)."""
    w1, b1, w2, b2, w3, b3 = params
    h1 = jnp.maximum(x @ w1 + b1, 0.0)
    h2 = jnp.maximum(h1 @ w2 + b2, 0.0)
    return h2 @ w3 + b3


def mlp_reference_bf16(x, params, compute_dtype=jnp.bfloat16):
    """Reference using the same bf16-operand / f32-accumulate recipe as the kernel."""
    w1, b1, w2, b2, w3, b3 = params
    h1 = jnp.maximum(
        jnp.dot(x.astype(compute_dtype), w1.astype(compute_dtype),
                preferred_element_type=jnp.float32) + b1, 0.0)
    h2 = jnp.maximum(
        jnp.dot(h1.astype(compute_dtype), w2.astype(compute_dtype),
                preferred_element_type=jnp.float32) + b2, 0.0)
    return h2 @ w3 + b3


if __name__ == "__main__":
    key = jax.random.PRNGKey(0)
    kx, kp = jax.random.split(key)

    batch, input_dim = 32, 32
    x = jax.random.normal(kx, (batch, input_dim), jnp.float32)
    params = init_params(kp, input_dim)

    # Small batch_tile only to exercise a multi-step grid at test size; the
    # performance path uses the adaptive default (batch_tile=None).
    out_multi = jax.block_until_ready(
        mlp_classifier_forward(x, params, batch_tile=8))
    out_default = jax.block_until_ready(mlp_classifier_forward(x, params))

    ref_bf16 = mlp_reference_bf16(x, params)
    ref_f32 = mlp_reference_f32(x, params)

    assert out_multi.shape == (batch, 1), out_multi.shape
    assert out_default.shape == (batch, 1), out_default.shape
    assert jnp.allclose(out_multi, ref_bf16, atol=2e-3, rtol=2e-3), (out_multi, ref_bf16)
    assert jnp.allclose(out_default, ref_bf16, atol=2e-3, rtol=2e-3), (out_default, ref_bf16)
    # bf16 operands vs. pure-f32 math: loose tolerance
    assert jnp.allclose(out_multi, ref_f32, atol=5e-2, rtol=5e-2), (out_multi, ref_f32)

    print("KERNEL_OK")
</pallas_src>

<mosaic_0001>
module attributes {stable_mosaic.version = 11 : i64} {
  func.func @mlp_kernel(%arg0: i32, %arg1: memref<8x32xf32, #tpu.memory_space<vmem>>, %arg2: memref<32x64xbf16, #tpu.memory_space<vmem>>, %arg3: memref<1x64xf32, #tpu.memory_space<vmem>>, %arg4: memref<64x8xbf16, #tpu.memory_space<vmem>>, %arg5: memref<1x8xf32, #tpu.memory_space<vmem>>, %arg6: memref<1x8xf32, #tpu.memory_space<vmem>>, %arg7: memref<1xf32, #tpu.memory_space<smem>>, %arg8: memref<1x1x8xf32, #tpu.memory_space<vmem>>) attributes {dimension_semantics = [#tpu.dimension_semantics<parallel>], iteration_bounds = array<i64: 4>, scalar_prefetch = 0 : i64, scratch_operands = 0 : i64, tpu.core_type = #tpu.core_type<tc>, window_params = [{transform_indices = @transform_0, window_bounds = array<i64: 8, 32>}, {pipeline_mode = #tpu.pipeline_mode<synchronous>, transform_indices = @transform_1, window_bounds = array<i64: 32, 64>}, {pipeline_mode = #tpu.pipeline_mode<synchronous>, transform_indices = @transform_2, window_bounds = array<i64: 1, 64>}, {pipeline_mode = #tpu.pipeline_mode<synchronous>, transform_indices = @transform_3, window_bounds = array<i64: 64, 8>}, {pipeline_mode = #tpu.pipeline_mode<synchronous>, transform_indices = @transform_4, window_bounds = array<i64: 1, 8>}, {pipeline_mode = #tpu.pipeline_mode<synchronous>, transform_indices = @transform_5, window_bounds = array<i64: 1, 8>}, {transform_indices = @transform_6, window_bounds = array<i64: 1>}, {transform_indices = @transform_7, window_bounds = array<i64: 1, 1, 8>}]} {
    %c0 = arith.constant 0 : index
    %c0_0 = arith.constant 0 : index
    %0 = vector.load %arg1[%c0, %c0_0] : memref<8x32xf32, #tpu.memory_space<vmem>>, vector<8x32xf32>
    %1 = arith.truncf %0 : vector<8x32xf32> to vector<8x32xbf16>
    %c0_1 = arith.constant 0 : index
    %c0_2 = arith.constant 0 : index
    %2 = vector.load %arg2[%c0_1, %c0_2] : memref<32x64xbf16, #tpu.memory_space<vmem>>, vector<32x64xbf16>
    %cst = arith.constant dense<0.000000e+00> : vector<8x64xf32>
    %3 = tpu.matmul %1, %2, %cst {dimension_numbers = #tpu.dot_dimension_numbers<[1], [0], [0], [1], [0, 0, 1, 1], [], []>} : vector<8x32xbf16>, vector<32x64xbf16>, vector<8x64xf32> -> vector<8x64xf32>
    %c0_3 = arith.constant 0 : index
    %c0_4 = arith.constant 0 : index
    %4 = vector.load %arg3[%c0_3, %c0_4] : memref<1x64xf32, #tpu.memory_space<vmem>>, vector<1x64xf32>
    %5 = vector.broadcast %4 : vector<1x64xf32> to vector<8x64xf32>
    %6 = arith.addf %3, %5 : vector<8x64xf32>
    %cst_5 = arith.constant 0.000000e+00 : f32
    %7 = vector.broadcast %cst_5 : f32 to vector<8x64xf32>
    %8 = arith.maximumf %6, %7 : vector<8x64xf32>
    %9 = arith.truncf %8 : vector<8x64xf32> to vector<8x64xbf16>
    %c0_6 = arith.constant 0 : index
    %c0_7 = arith.constant 0 : index
    %10 = vector.load %arg4[%c0_6, %c0_7] : memref<64x8xbf16, #tpu.memory_space<vmem>>, vector<64x8xbf16>
    %cst_8 = arith.constant dense<0.000000e+00> : vector<8x8xf32>
    %11 = tpu.matmul %9, %10, %cst_8 {dimension_numbers = #tpu.dot_dimension_numbers<[1], [0], [0], [1], [0, 0, 1, 1], [], []>} : vector<8x64xbf16>, vector<64x8xbf16>, vector<8x8xf32> -> vector<8x8xf32>
    %c0_9 = arith.constant 0 : index
    %c0_10 = arith.constant 0 : index
    %12 = vector.load %arg5[%c0_9, %c0_10] : memref<1x8xf32, #tpu.memory_space<vmem>>, vector<1x8xf32>
    %13 = vector.broadcast %12 : vector<1x8xf32> to vector<8x8xf32>
    %14 = arith.addf %11, %13 : vector<8x8xf32>
    %cst_11 = arith.constant 0.000000e+00 : f32
    %15 = vector.broadcast %cst_11 : f32 to vector<8x8xf32>
    %16 = arith.maximumf %14, %15 : vector<8x8xf32>
    %c0_12 = arith.constant 0 : index
    %c0_13 = arith.constant 0 : index
    %17 = vector.load %arg6[%c0_12, %c0_13] : memref<1x8xf32, #tpu.memory_space<vmem>>, vector<1x8xf32>
    %cst_14 = arith.constant dense<0.000000e+00> : vector<1x8xf32>
    %18 = tpu.matmul %17, %16, %cst_14 {dimension_numbers = #tpu.dot_dimension_numbers<[1], [1], [0], [0], [0, 0, 1, 0], [], []>} : vector<1x8xf32>, vector<8x8xf32>, vector<1x8xf32> -> vector<1x8xf32>
    %c0_15 = arith.constant 0 : index
    %19 = memref.load %arg7[%c0_15] : memref<1xf32, #tpu.memory_space<smem>>
    %20 = vector.broadcast %19 : f32 to vector<1x8xf32>
    %21 = arith.addf %18, %20 : vector<1x8xf32>
    %c0_16 = arith.constant 0 : index
    %c0_17 = arith.constant 0 : index
    %c0_18 = arith.constant 0 : index
    %22 = vector.load %arg8[%c0_16, %c0_17, %c0_18] : memref<1x1x8xf32, #tpu.memory_space<vmem>>, vector<1x1x8xf32>
    %23 = vector.shape_cast %22 : vector<1x1x8xf32> to vector<1x8xf32>
    %24 = vector.shape_cast %21 : vector<1x8xf32> to vector<1x1x8xf32>
    tpu.vector_store %arg8[%c0_16, %c0_17, %c0_18], %24 {strides = array<i32>} : memref<1x1x8xf32, #tpu.memory_space<vmem>>, vector<1x1x8xf32>,
    return
  }
  func.func @transform_0(%arg0: i32) -> (i32, i32) {
    %c0_i32 = arith.constant 0 : i32
    %c0_i32_0 = arith.constant 0 : i32
    return %arg0, %c0_i32 : i32, i32
  }
  func.func @transform_1(%arg0: i32) -> (i32, i32) {
    %c0_i32 = arith.constant 0 : i32
    %c0_i32_0 = arith.constant 0 : i32
    %c0_i32_1 = arith.constant 0 : i32
    return %c0_i32, %c0_i32_0 : i32, i32
  }
  func.func @transform_2(%arg0: i32) -> (i32, i32) {
    %c0_i32 = arith.constant 0 : i32
    %c0_i32_0 = arith.constant 0 : i32
    %c0_i32_1 = arith.constant 0 : i32
    return %c0_i32, %c0_i32_0 : i32, i32
  }
  func.func @transform_3(%arg0: i32) -> (i32, i32) {
    %c0_i32 = arith.constant 0 : i32
    %c0_i32_0 = arith.constant 0 : i32
    %c0_i32_1 = arith.constant 0 : i32
    return %c0_i32, %c0_i32_0 : i32, i32
  }
  func.func @transform_4(%arg0: i32) -> (i32, i32) {
    %c0_i32 = arith.constant 0 : i32
    %c0_i32_0 = arith.constant 0 : i32
    %c0_i32_1 = arith.constant 0 : i32
    return %c0_i32, %c0_i32_0 : i32, i32
  }
  func.func @transform_5(%arg0: i32) -> (i32, i32) {
    %c0_i32 = arith.constant 0 : i32
    %c0_i32_0 = arith.constant 0 : i32
    %c0_i32_1 = arith.constant 0 : i32
    return %c0_i32, %c0_i32_0 : i32, i32
  }
  func.func @transform_6(%arg0: i32) -> i32 {
    %c0_i32 = arith.constant 0 : i32
    %c0_i32_0 = arith.constant 0 : i32
    return %c0_i32 : i32
  }
  func.func @transform_7(%arg0: i32) -> (i32, i32, i32) {
    %c0_i32 = arith.constant 0 : i32
    %c0_i32_0 = arith.constant 0 : i32
    %c0_i32_1 = arith.constant 0 : i32
    return %arg0, %c0_i32, %c0_i32_0 : i32, i32, i32
  }
}

</mosaic_0001>

<bundles_post_ra>
// kernel: tpu_custom_call.1
= control target key start
LH: loop header
LB: loop body
LE: loop exit
PB: predicated region body
PF: predicated region fallthrough
CT: control target
= control target key end

     0   :  { %s1028_s0 = inlined_call_operand.vmem [shape: f32[32,32], index: 0, kind: input, shape index: {}]   ;;  %s1029_s1 = inlined_call_operand.hbm [shape: bf16[32,64], index: 1, kind: input, shape index: {}]   ;;  %s1030_s2 = inlined_call_operand.vmem [shape: f32[1,64], index: 2, kind: input, shape index: {}]   ;;  %s1031_s3 = inlined_call_operand.vmem [shape: bf16[64,8], index: 3, kind: input, shape index: {}]   ;;  %s1032_s4 = inlined_call_operand.vmem [shape: f32[1,8], index: 4, kind: input, shape index: {}]   ;;  %s1033_s5 = inlined_call_operand.vmem [shape: f32[1,8], index: 5, kind: input, shape index: {}]   ;;  %s1034_s6 = inlined_call_operand.<no memory space> [shape: f32[1], index: 6, kind: input, shape index: {}]   ;;  %s1035_s7 = inlined_call_operand.hbm [shape: f32[4,1,8], index: 7, kind: output, shape index: {}]  }
   0x1   :  { %12 = sst [smem:[#allocation2]] %s1034_s6 }
   0x2   :  { %13 = vsyncpa [#allocation4], 0 }
   0x3   :  { %14 = vsyncpa [#allocation5], 0 }
   0x4   :  { %16 = vsyncpa [#allocation5 + $0x1], 0  ;;  %s869_s26 = smov 0   ;;  %s871_s27 = smov 0  }
   0x5   :  { %s873_s28 = smov 0   ;;  %s875_s29 = smov 0  }
   0x6 LB: > { %s890_s6 = sadd.s32 4294967295, %s818_s29   ;;  %s607_s30 = sadd.s32 4294967294, %s818_s29   ;;  %s818_s29 = sphi %s875_s29, %s1051_s29   ;;  %s814_s28 = sphi %s873_s28, %s1050_s28   ;;  %s810_s27 = sphi %s871_s27, %s1049_s27   ;;  %s806_s26 = sphi %s869_s26, %s1048_s26  }
   0x7   : > { %s894_s8 = sadd.s32 1, %s818_s29   ;;  %s181_s9 = sadd.s32 1, %s814_s28 }
   0x8   : > { %s178_s10 = ssub.s32 %s818_s29, %s894_s8  ;;  %p191_p0 = scmp.ne.s32.totalorder %s814_s28, %s810_s27 }
   0x9   : > { %p179_p1 = scmp.eq.s32.totalorder %s178_s10, 0  ;;  %p192_p2 = scmp.eq.s32.totalorder %s890_s6, 3 }
   0xa   : > { %p197_p3 = scmp.ne.s32.totalorder %s810_s27, %s806_s26  ;;  %p198_p4 = scmp.eq.s32.totalorder %s607_s30, 3 }
   0xb   : > { %s905_s11 = scalar_select %p179_p1, %s814_s28, %s181_s9  }
   0xc   : > { %p907_p5 = por %p192_p2, %p191_p0  ;;  %p911_p6 = por %p198_p4, %p197_p3 }
   0xd   : > { %p608_p7 = scmp.ge.s32.totalorder %s818_s29, 1  ;;  %p205_p8 = scmp.lt.s32.totalorder %s818_s29, 5 }
   0xe   : > { %s1039_s12 = scalar_select %p907_p5, 1, 0 }
   0xf   : > { %s1040_s13 = scalar_select %p911_p6, 1, 0 }
  0x10   : > { %p1036_p9 = scmp.eq.s32.totalorder %s890_s6, 0  ;;  %p918_p10 = pnand %p608_p7, %p205_p8 }
  0x11   : > { %s820_s15 = smov [#allocation3]   ;;  %s724_s20 = scalar_lea.hbm %s1029_s1, 256 }
  0x12   : > { %s1041_s14 = scalar_select %p918_p10, 1, 0 }
  0x13   : > { %s217_s16 = sshll.u32 %s820_s15, 4  ;;  %p670_p11 = pneg %p918_p10  ;;  %s218_s16 = int_to_ptr.vmem [resolvable:$true] %s217_s16 }
  0x14   : > { %p725_p13 = scmp.ne.s32.totalorder %s1029_s1, %s724_s20  ;;  %p731_p3 = scmp.lt.u32.totalorder %s724_s20, %s1029_s1 }
  0x15   : > { %p926_p12 = pnand %p1036_p9, %p670_p11 }
  0x17   : > { %p726_p0 = pneg %p926_p12 }
  0x19   : > { %p727_p1 = pnand %p726_p0, %p725_p13 }
  0x1b   : > { %p728_p2 = pneg %p727_p1 }
  0x1d   : > { %p733_p4 = pnand %p731_p3, %p728_p2 }
  0x1f   : > { %736 = shalt.err (!%p733_p4)
}
  0x20   : > { %s737_s25 = scalar_lea.vmem %s218_s16, 256  ;;  %p745_p9 = scmp.lt.s32.totalorder %s218_s16, %s218_s16 }
  0x21   : > { %p738_p7 = scmp.ne.s32.totalorder %s218_s16, %s737_s25  ;;  %p746_p6 = scmp.lt.s32.totalorder %s737_s25, %s737_s25 }
  0x23   : > { %p740_p8 = pnand %p738_p7, %p726_p0  ;;  %p747_p5 = por %p746_p6, %p745_p9 }
  0x25   : > { %p741_p11 = pneg %p740_p8 }
  0x27   : > { %p748_p10 = pnand %p747_p5, %p741_p11 }
  0x29   : > { %751 = shalt.err (!%p748_p10)
}
  0x2a   : > { %s821_s30 = smov 64   ;;  %s822_s9 = smov 4  }
  0x2b   : > { %673 = dma.hbm_to_vmem [thread:$0]  (!%p926_p12), %s1029_s1, 256, %s218_s16, [#allocation4], %s821_s30, %s821_s30, %s822_s9  }
  0x2c   : > { %p1043_p13 = scmp.ne.s32.totalorder %s1041_s14, 0 }
  0x2d   : > { %p1044_p1 = scmp.eq.s32.totalorder (!%p1043_p13), %s890_s6, 0 }
  0x2e   : > { %255 = sbr.rel (%p1043_p13) target bundleno = 729 (0x2d9), region = 48 }
  0x35   : > { %797 = dma.done.wait (%p1044_p1), [#allocation4], 256   ;;  %p1045_p0 = pmov %p1044_p1 }
  0x36   : > { %p285_p5 = scmp.lt.s32.totalorder %s890_s6, 3  ;;  %v823_v0 = vmov 0.0   ;;  %vm824_vm0 = vmmov 0   ;;  %v718_v1 = vld [vmem:[#allocation3] sm:$0xff]   ;;  %v719_v2 = vld [vmem:[#allocation3 + $0x8] sm:$0xff]   ;;  %vm315_vm1 = vcmask 261120  }
  0x37   : > { %799 = vsyncadd (%p1045_p0), [#allocation4], 4294967040  ;;  %639 = vmatprep.subr.bf16.mxu0 %v823_v0  ;;  %643 = vmatprep.mubr.msk.bf16.mxu0 %vm824_vm0, %v823_v0  ;;  %v720_v4 = vld [vmem:[%s1031_s3] sm:$0xff]   ;;  %v721_v5 = vld [vmem:[%s1031_s3 + $0x8] sm:$0xff]   ;;  %vm400_vm2 = vcmask 523264   ;;  %vm448_vm3 = vcmask 64512  }
  0x38   : > { %s286_s17 = scalar_select %p285_p5, %s890_s6, 3  ;;  %647 = vmatprep.subr.bf16.mxu1 %v823_v0  ;;  %655 = vmatprep.mubr.msk.bf16.mxu1 %vm824_vm0, %v823_v0  ;;  %v722_v7 = vld [vmem:[%s1031_s3 + $0x10] sm:$0xff]   ;;  %v723_v8 = vld [vmem:[%s1031_s3 + $0x18] sm:$0xff]   ;;  %v614_v9 = vld [vmem:[%s1030_s2] ss:$0 sm:$0xff]  ;;  %vm525_vm4 = vcmask 57344  }
  0x39   : > { %640 = vmatpush3.bf16.msra.mxu0 %v718_v1  ;;  %648 = vmatpush3.bf16.msra.mxu1 %v720_v4  ;;  %v618_v17 = vld [vmem:[%s1032_s4] ss:$0 sm:$0xff]  ;;  %s283_s20 = sand.u32 1, %s810_s27   ;;  %s626_s21 = sshll.u32 %s890_s6, 4 }
  0x3a   : > { %s613_s14 = sshll.u32 %s286_s17, 3  ;;  %641 = vmatprep.subr.bf16.mxu0 %v823_v0  ;;  %649 = vmatprep.subr.bf16.mxu1 %v823_v0  ;;  %v445_v24 = vld [vmem:[%s1033_s5] sm:$0x1]  ;;  %s284_s22 = scalar_lea.vmem [#allocation6], %s283_s20 }
  0x3b   : > { %s288_s19 = scalar_lea.vmem %s1028_s0, %s613_s14  ;;  %s540_s23 = sshll.u32 %s284_s22, 4  ;;  %s988_s23 = int_to_ptr.vmem [resolvable:$true] %s540_s23 }
  0x3c   : > { %v290_v3 = vld [vmem:[%s288_s19] sm:$0xff]  ;;  %s446_s19 = sld [smem:[#allocation2]]  ;;  %s986_s30 = scalar_lea.hbm %s1035_s7, %s626_s21 }
  0x3d   : > { %v291_v6 = vpack.c.bf16 %v290_v3, %v290_v3  ;;  %642 = vmatpush3.bf16.msra.mxu0 %v719_v2  ;;  %650 = vmatpush3.bf16.msra.mxu1 %v721_v5  ;;  %s528_s9 = scalar_lea.sflag [#allocation5], %s283_s20  ;;  %s752_s10 = scalar_lea.vmem %s988_s23, 16 }
  0x3e   : > { %659 = vmatprep.subr.mxu0 %v823_v0  ;;  %651 = vmatprep.subr.bf16.mxu1 %v823_v0  ;;  %p753_p6 = scmp.ne.s32.totalorder %s988_s23, %s752_s10  ;;  %p1046_p9 = scmp.ne.s32.totalorder %s1039_s12, 0 }
  0x3f   : > { %s825_s6 = smov [#allocation6]  }
  0x40   : > { %644 = vmatmul.mubr.msk.bf16.vlgmr.msra.gmra.mrb[0].mxu0 %vm315_vm1, %v291_v6  ;;  %p754_p10 = pnand %p753_p6, %p1046_p9  ;;  %s756_s15 = sshll.u32 %s825_s6, 4  ;;  %s757_s15 = int_to_ptr.vmem [resolvable:$false] %s756_s15 }
  0x41   : > { %661 = vmatprep.mubr.msk.f32.mxu0 %vm824_vm0, %v823_v0  ;;  %652 = vmatpush3.bf16.msra.mxu1 %v722_v7  ;;  %s758_s17 = scalar_lea.vmem %s757_s15, 32  ;;  %p759_p2 = scmp.lt.s32.totalorder %s988_s23, %s757_s15 }
  0x42   : > { %653 = vmatprep.subr.bf16.mxu1 %v823_v0  ;;  %v447_v25 = vstv %s446_s19  ;;  %p755_p12 = pneg %p754_p10  ;;  %p760_p3 = scmp.lt.s32.totalorder %s758_s17, %s752_s10 }
  0x44   : > { %p761_p4 = por %p760_p3, %p759_p2 }
  0x45   : > { %654 = vmatpush3.bf16.msra.mxu1 %v723_v8 }
  0x46   : > { %p762_p7 = pnand %p761_p4, %p755_p12 }
 0x113   : > { %v353_v10 = vpop.f32.mrb[0].mxu0 }
 0x114   : > { %v354_v11 = vadd.f32 %v614_v9, %v353_v10  ;;  %v645_v12 = vpop.f32.mrb[1].mxu0 }
 0x115   : > { %v356_v13 = vpop.f32.mrb[2].mxu0 }
 0x116   : > { %v359_v14 = vmax.f32 %v354_v11, 0.0  ;;  %v646_v15 = vpop.f32.mrb[3].mxu0 }
 0x118   : > { %v360_v16 = vpack.c.bf16 %v359_v14, %v359_v14 }
 0x11a   : > { %656 = vmatmul.mubr.msk.bf16.vlgmr.msra.gmra.mrb[0].mxu1 %vm400_vm2, %v360_v16 }
 0x1ed   : > { %v438_v18 = vpop.f32.mrb[0].mxu1 }
 0x1ee   : > { %v439_v19 = vadd.f32 %v618_v17, %v438_v18  ;;  %v657_v20 = vpop.f32.mrb[1].mxu1 }
 0x1ef   : > { %v441_v21 = vpop.f32.mrb[2].mxu1 }
 0x1f0   : > { %v444_v22 = vmax.f32 %v439_v19, 0.0  ;;  %v658_v23 = vpop.f32.mrb[3].mxu1 }
 0x1f2   : > { %660 = vmatpush3.xpose.msk.msra.mxu0 %vm448_vm3, %v444_v22 }
 0x1f5   : > { %662 = vmatmul.mubr.msk.f32.vlgmr.msra.gmra.mrb[4].mxu0 %vm448_vm3, %v445_v24 }
 0x2c8   : > { %v521_v26 = vpop.f32.mrb[4].mxu0 }
 0x2c9   : > { %v522_v27 = vadd.f32 %v521_v26, %v447_v25  ;;  %v663_v28 = vpop.f32.mrb[5].mxu0 }
 0x2cb   : > { %526 = vst.msk [vmem:[%s284_s22] sm:$0x1] %vm525_vm4, %v522_v27 }
 0x2cc   : > { %765 = shalt.err (!%p762_p7)
}
 0x2cd   : > { %s766_s14 = scalar_lea.hbm %s986_s30, 16  ;;  %s770_s19 = scalar_lea.hbm %s1035_s7, 64 }
 0x2ce   : > { %p767_p8 = scmp.ne.s32.totalorder %s986_s30, %s766_s14  ;;  %p771_p1 = scmp.lt.u32.totalorder %s986_s30, %s1035_s7 }
 0x2cf   : > { %p772_p0 = scmp.lt.u32.totalorder %s770_s19, %s766_s14  ;;  %p774_p6 = scmp.lt.u32.totalorder %s766_s14, %s986_s30 }
 0x2d0   : > { %p768_p11 = pnand %p767_p8, %p1046_p9 }
 0x2d1   : > { %p773_p5 = por %p772_p0, %p771_p1 }
 0x2d2   : > { %p769_p13 = pneg %p768_p11 }
 0x2d3   : > { %p775_p10 = por %p774_p6, %p773_p5 }
 0x2d5   : > { %p776_p12 = pnand %p775_p10, %p769_p13 }
 0x2d7   : > { %779 = shalt.err (!%p776_p12)
}
 0x2d8   : > { %668 = dma.vmem_to_hbm [thread:$0]  (%p1046_p9), %s988_s23, 16, %s986_s30, %s528_s9  }
 0x2d9 PF: > { %p680_p2 = scmp.ge.s32.totalorder %s818_s29, 2  ;;  %s552_s22 = sand.u32 1, %s806_s26  }
 0x2da   : > { %p1047_p3 = scmp.ne.s32.totalorder %s1040_s13, 0  ;;  %s553_s24 = scalar_lea.sflag [#allocation5], %s552_s22 }
 0x2dc   : > { %p675_p4 = pnand %p680_p2, %p1047_p3 }
 0x2de   : > { %801 = dma.done.wait (!%p675_p4), %s553_s24, 16  }
 0x2df   : > { %803 = vsyncadd (!%p675_p4), %s553_s24, 4294967280  ;;  %p19_p7 = scmp.ge.s32.totalorder %s894_s8, 6   ;;  %s1048_s26 = smov %s810_s27 }
 0x2e0   : > { %s1049_s27 = smov %s814_s28  ;;  %s1050_s28 = smov %s905_s11 }
 0x2e1   : > { %s1051_s29 = smov %s894_s8  ;;  %21 = sbr.rel (!%p19_p7) target bundleno = 6 (0x6), region = 88 }
 0x2e8   :  { %557 = vsyncpa [#allocation4], 1 }
 0x2e9   :  { %559 = vsyncpa [#allocation4 + $0x1], 1 }
 0x2ea   :  { %560 = vsyncpa [#allocation5], 1 }
 0x2eb   :  { %562 = vsyncpa [#allocation5 + $0x1], 1 }

</bundles_post_ra>
